<compile_context>
chip_gen: v6e
topology: v6e:2x2x1
jax: 0.10.0
libtpu: 0.0.40
codegen_flags: <defaults>
</compile_context>

<pallas_src>
import functools

import jax
import jax.numpy as jnp
from jax.experimental import pallas as pl
from jax.experimental.pallas import tpu as pltpu


_INV_SQRT2 = 0.7071067811865476
_SQRT_2_OVER_PI = 0.7978845608028654


def _gelu_erf(x):
    # torch.nn.GELU() default: 0.5 * x * (1 + erf(x / sqrt(2)))
    return 0.5 * x * (1.0 + jax.lax.erf(x * _INV_SQRT2))


def _gelu_tanh(x):
    # tanh approximation: routes the transcendental to the EUP (idle slot
    # here), freeing VALU cycles vs. the erf polynomial.  Opt-in only, to
    # keep exact nn.GELU() semantics by default.
    return 0.5 * x * (1.0 + jnp.tanh(_SQRT_2_OVER_PI * (x + 0.044715 * x * x * x)))


def _round_up(x, m):
    return ((x + m - 1) // m) * m


def _pick_hidden_tile(h, target):
    """Largest 256- (preferred) or 128-aligned tile <= target dividing h."""
    if h <= target:
        return h
    for align in (256, 128):   # 256 feeds v6e/v7x 2x256^2 MXU; 128 for v5e
        t = (target // align) * align
        while t >= align:
            if h % t == 0:
                return t
            t -= align
    return h


def _vmem_capacity_bytes():
    try:
        return int(pltpu.get_tpu_info().vmem_capacity_bytes)
    except Exception:
        return 64 << 20   # conservative fallback: valid on every generation


# ----------------------------------------------------------------------------
# Kernels
# ----------------------------------------------------------------------------

def _make_resident_kernel(tH, n_chunks, gelu_fn):
    """Weights fully resident in VMEM; hidden axis chunked inside the kernel."""

    def kernel(x_ref, w1_ref, b1_ref, w2_ref, b2_ref, o_ref, acc_ref):
        x = x_ref[...]
        # Static (unrolled) loop over hidden chunks: bounds the f32 GELU
        # intermediate to (tm, tH); acc_ref bounds live ranges between chunks.
        for c in range(n_chunks):
            h0 = c * tH
            h = jnp.dot(x, w1_ref[:, h0:h0 + tH],
                        preferred_element_type=jnp.float32)
            h = gelu_fn(h + b1_ref[:, h0:h0 + tH])
            p = jnp.dot(h.astype(w2_ref.dtype), w2_ref[h0:h0 + tH, :],
                        preferred_element_type=jnp.float32)
            if c == 0:
                acc_ref[...] = p
            else:
                acc_ref[...] += p
        # bias2 once per output tile; dropout = eval-mode identity.
        # TODO(synk): training-mode dropout (pltpu.prng_* + mask) not implemented.
        o_ref[...] = (acc_ref[...] + b2_ref[...]).astype(o_ref.dtype)

    return kernel


def _make_streamed_kernel(gelu_fn):
    """Two-axis grid: token tiles (parallel) x hidden chunks (arbitrary)."""

    def kernel(x_ref, w1_ref, b1_ref, w2_ref, b2_ref, o_ref, acc_ref):
        h_idx = pl.program_id(1)

        @pl.when(h_idx == 0)
        def _init():
            acc_ref[...] = jnp.zeros_like(acc_ref)

        h = jnp.dot(x_ref[...], w1_ref[...], preferred_element_type=jnp.float32)
        h = gelu_fn(h + b1_ref[...])
        acc_ref[...] += jnp.dot(h.astype(w2_ref.dtype), w2_ref[...],
                                preferred_element_type=jnp.float32)

        @pl.when(h_idx == pl.num_programs(1) - 1)
        def _finalize():
            # TODO(synk): training-mode dropout not implemented (eval identity).
            o_ref[...] = (acc_ref[...] + b2_ref[...]).astype(o_ref.dtype)

    return kernel


# ----------------------------------------------------------------------------
# Wrapper
# ----------------------------------------------------------------------------

def multi_lp(x, w_fc, b_fc, w_proj, b_proj, *,
             compute_dtype=jnp.bfloat16, approximate_gelu=False,
             tm_target=None, th_target=None):
    """Fused project(gelu(fc(x))) with eval-mode dropout.

    x:      (B, T, E)
    w_fc:   (E, 4E)   stored (in, out)
    b_fc:   (4E,)
    w_proj: (4E, E)
    b_proj: (E,)

    Pass w_fc / w_proj already in `compute_dtype` to skip the per-call cast
    (one fewer HBM pass over the weights).
    """
    B, T, E = x.shape
    H = w_fc.shape[1]
    M = B * T
    out_dtype = x.dtype
    cdt = jnp.dtype(compute_dtype) if compute_dtype is not None else jnp.dtype(x.dtype)
    cbytes = cdt.itemsize
    obytes = jnp.dtype(out_dtype).itemsize

    # --- per-generation VMEM budget & tile targets --------------------------
    vmem_cap = _vmem_capacity_bytes()
    budget = int(0.82 * vmem_cap)          # ~105 MiB on v5e/v6e, ~52 MiB on v7x
    small_vmem = vmem_cap < (96 << 20)     # v7x-like: 64 MiB / TC, 2 TCs / chip

    if tm_target is None:
        # Roofline ridge: v6e needs ~650 FLOPs/byte over the weight stream,
        # v7x ~310 -> bigger token tiles on the 128 MiB parts.
        tm_target = 512 if small_vmem else 1024
    if th_target is None:
        th_target = 256 if small_vmem else 512

    tm = min(tm_target, _round_up(M, 8))   # token tile (multiple of 8)
    tH = _pick_hidden_tile(H, th_target)   # hidden (4E) chunk, lane-aligned

    # v7x has 2 TensorCores sharing the "parallel" axis: guarantee >= 2 token
    # programs so the second core isn't idle.  (No effect on v5e/v6e: 1 TC.)
    if small_vmem and _round_up(M, tm) // tm < 2 and tm >= 16:
        tm = max(_round_up(tm // 2, 8), 8)

    gelu_fn = _gelu_tanh if approximate_gelu else _gelu_erf

    # --- VMEM footprint estimates (double-buffered inputs/outputs) ----------
    def _resident_est(tm_, tH_):
        return (2 * tm_ * E * cbytes                # x tile
                + 2 * (E * H + H * E) * cbytes      # W1 + W2 (worst case 2 bufs)
                + 4 * (H + E) * 4                   # biases (f32)
                + 2 * tm_ * E * obytes              # output tile
                + tm_ * E * 4                       # f32 accumulator
                + 2 * tm_ * tH_ * 4)                # per-chunk f32 hidden + headroom

    def _streamed_est(tm_, tH_):
        return (2 * (tm_ * E + E * tH_ + tH_ * E) * cbytes
                + 4 * (tH_ + E) * 4
                + 2 * tm_ * E * obytes
                + tm_ * E * 4
                + 2 * tm_ * tH_ * 4)

    resident = _resident_est(tm, tH) <= budget
    if resident:
        vmem_est = _resident_est(tm, tH)
    else:
        # Streaming path: shrink tiles until the footprint fits the budget.
        while _streamed_est(tm, tH) > budget and tm > 128:
            tm = _round_up(tm // 2, 8)
        t = tH
        while _streamed_est(tm, tH) > budget and t > 128:
            t //= 2
            tH = _pick_hidden_tile(H, max(t, 128))
        vmem_est = _streamed_est(tm, tH)

    # Always set the scoped-VMEM limit explicitly (the default is only 16 MiB
    # on v5e / 32 MiB on v6e-v7x); cap just under physical VMEM.
    vmem_limit = int(min(int(0.95 * vmem_cap), max(vmem_est * 3 // 2, 24 << 20)))

    # --- operand prep (casts only when needed -> hoistable by the caller) ---
    M_pad = _round_up(M, tm)
    x2d = x.reshape(M, E)
    if x2d.dtype != cdt:
        x2d = x2d.astype(cdt)
    if M_pad != M:
        x2d = jnp.pad(x2d, ((0, M_pad - M), (0, 0)))
    w1 = w_fc if w_fc.dtype == cdt else w_fc.astype(cdt)
    w2 = w_proj if w_proj.dtype == cdt else w_proj.astype(cdt)
    b1 = b_fc.reshape(1, H).astype(jnp.float32)   # biases stay f32 (tiny)
    b2 = b_proj.reshape(1, E).astype(jnp.float32)

    # NOTE: at real model sizes keep E a multiple of 128 so the output store
    # path is lane-dense; the toy E=32 below is inherently lane-sparse.

    if resident:
        # Weights DMA'd once (constant index maps -> no re-fetch across token
        # tiles); hidden axis chunked inside the kernel.
        n_chunks = H // tH
        out2d = pl.pallas_call(
            _make_resident_kernel(tH, n_chunks, gelu_fn),
            out_shape=jax.ShapeDtypeStruct((M_pad, E), out_dtype),
            grid_spec=pltpu.PrefetchScalarGridSpec(
                num_scalar_prefetch=0,
                grid=(M_pad // tm,),
                in_specs=[
                    pl.BlockSpec((tm, E), lambda i: (i, 0)),   # x token tile
                    pl.BlockSpec((E, H), lambda i: (0, 0)),    # W1 (resident)
                    pl.BlockSpec((1, H), lambda i: (0, 0)),    # b1 (resident)
                    pl.BlockSpec((H, E), lambda i: (0, 0)),    # W2 (resident)
                    pl.BlockSpec((1, E), lambda i: (0, 0)),    # b2 (resident)
                ],
                out_specs=pl.BlockSpec((tm, E), lambda i: (i, 0)),
                scratch_shapes=[pltpu.VMEM((tm, E), jnp.float32)],
            ),
            compiler_params=pltpu.CompilerParams(
                dimension_semantics=("parallel",),
                vmem_limit_bytes=vmem_limit,
            ),
        )(x2d, w1, b1, w2, b2)
    else:
        # Streaming path: W1/W2 chunks re-streamed per token tile (only taken
        # when they cannot be resident), f32 accumulator across the H axis.
        out2d = pl.pallas_call(
            _make_streamed_kernel(gelu_fn),
            out_shape=jax.ShapeDtypeStruct((M_pad, E), out_dtype),
            grid_spec=pltpu.PrefetchScalarGridSpec(
                num_scalar_prefetch=0,
                grid=(M_pad // tm, H // tH),
                in_specs=[
                    pl.BlockSpec((tm, E), lambda i, h: (i, 0)),   # x token tile
                    pl.BlockSpec((E, tH), lambda i, h: (0, h)),   # W1 H-chunk
                    pl.BlockSpec((1, tH), lambda i, h: (0, h)),   # b1 H-chunk
                    pl.BlockSpec((tH, E), lambda i, h: (h, 0)),   # W2 H-chunk
                    pl.BlockSpec((1, E), lambda i, h: (0, 0)),    # b2
                ],
                out_specs=pl.BlockSpec((tm, E), lambda i, h: (i, 0)),
                scratch_shapes=[pltpu.VMEM((tm, E), jnp.float32)],
            ),
            compiler_params=pltpu.CompilerParams(
                dimension_semantics=("parallel", "arbitrary"),
                vmem_limit_bytes=vmem_limit,
            ),
        )(x2d, w1, b1, w2, b2)

    return out2d[:M].reshape(B, T, E)


def multi_lp_ref(x, w_fc, b_fc, w_proj, b_proj):
    h = jnp.einsum("bte,eh->bth", x, w_fc) + b_fc
    h = 0.5 * h * (1.0 + jax.lax.erf(h * _INV_SQRT2))
    return jnp.einsum("bth,he->bte", h, w_proj) + b_proj


if __name__ == "__main__":
    # config: embed_dim=32, bias=True, dropout=0.1 (identity at inference)
    B, T, E = 2, 8, 32
    H = 4 * E

    key = jax.random.PRNGKey(0)
    kx, k1, k2, k3, k4 = jax.random.split(key, 5)
    x = jax.random.normal(kx, (B, T, E), dtype=jnp.float32)
    # deterministic "nn.Linear-like" init (scaled normal); stored (in, out)
    w_fc = jax.random.normal(k1, (E, H), dtype=jnp.float32) * (1.0 / jnp.sqrt(E))
    b_fc = jax.random.normal(k2, (H,), dtype=jnp.float32) * 0.02
    w_proj = jax.random.normal(k3, (H, E), dtype=jnp.float32) * (1.0 / jnp.sqrt(H))
    b_proj = jax.random.normal(k4, (E,), dtype=jnp.float32) * 0.02

    ref = multi_lp_ref(x, w_fc, b_fc, w_proj, b_proj)

    # f32 compute path: tight match against the f32 reference.
    out_f32 = jax.block_until_ready(
        multi_lp(x, w_fc, b_fc, w_proj, b_proj, compute_dtype=jnp.float32))
    assert out_f32.shape == (B, T, E)
    assert jnp.allclose(out_f32, ref, atol=1e-4, rtol=1e-4)

    # bf16 MXU path (default).  Weights pre-cast ONCE outside the call
    # (hoisted cast per perf review) -> no per-call f32->bf16 HBM pass.
    w_fc_c = w_fc.astype(jnp.bfloat16)
    w_proj_c = w_proj.astype(jnp.bfloat16)
    out_bf16 = jax.block_until_ready(
        multi_lp(x, w_fc_c, b_fc, w_proj_c, b_proj))
    assert out_bf16.shape == (B, T, E)
    assert jnp.allclose(out_bf16, ref, atol=5e-2, rtol=5e-2)

    print("KERNEL_OK")
</pallas_src>

<mosaic_0001>
module attributes {stable_mosaic.version = 11 : i64} {
  func.func @kernel(%arg0: i32, %arg1: memref<8x32xf32, #tpu.memory_space<vmem>>, %arg2: memref<32x128xf32, #tpu.memory_space<vmem>>, %arg3: memref<1x128xf32, #tpu.memory_space<vmem>>, %arg4: memref<128x32xf32, #tpu.memory_space<vmem>>, %arg5: memref<1x32xf32, #tpu.memory_space<vmem>>, %arg6: memref<8x32xf32, #tpu.memory_space<vmem>>, %arg7: memref<8x32xf32, #tpu.memory_space<vmem>>) attributes {dimension_semantics = [#tpu.dimension_semantics<parallel>], iteration_bounds = array<i64: 2>, scalar_prefetch = 0 : i64, scratch_operands = 1 : i64, tpu.core_type = #tpu.core_type<tc>, window_params = [{transform_indices = @transform_0, window_bounds = array<i64: 8, 32>}, {pipeline_mode = #tpu.pipeline_mode<synchronous>, transform_indices = @transform_1, window_bounds = array<i64: 32, 128>}, {pipeline_mode = #tpu.pipeline_mode<synchronous>, transform_indices = @transform_2, window_bounds = array<i64: 1, 128>}, {pipeline_mode = #tpu.pipeline_mode<synchronous>, transform_indices = @transform_3, window_bounds = array<i64: 128, 32>}, {pipeline_mode = #tpu.pipeline_mode<synchronous>, transform_indices = @transform_4, window_bounds = array<i64: 1, 32>}, {transform_indices = @transform_5, window_bounds = array<i64: 8, 32>}]} {
    %c0 = arith.constant 0 : index
    %c0_0 = arith.constant 0 : index
    %0 = vector.load %arg1[%c0, %c0_0] : memref<8x32xf32, #tpu.memory_space<vmem>>, vector<8x32xf32>
    %c0_1 = arith.constant 0 : index
    %c0_2 = arith.constant 0 : index
    %1 = vector.load %arg2[%c0_1, %c0_2] : memref<32x128xf32, #tpu.memory_space<vmem>>, vector<32x128xf32>
    %cst = arith.constant dense<0.000000e+00> : vector<8x128xf32>
    %2 = tpu.matmul %0, %1, %cst {dimension_numbers = #tpu.dot_dimension_numbers<[1], [0], [0], [1], [0, 0, 1, 1], [], []>} : vector<8x32xf32>, vector<32x128xf32>, vector<8x128xf32> -> vector<8x128xf32>
    %c0_3 = arith.constant 0 : index
    %c0_4 = arith.constant 0 : index
    %3 = vector.load %arg3[%c0_3, %c0_4] : memref<1x128xf32, #tpu.memory_space<vmem>>, vector<1x128xf32>
    %4 = vector.broadcast %3 : vector<1x128xf32> to vector<8x128xf32>
    %5 = arith.addf %2, %4 : vector<8x128xf32>
    %cst_5 = arith.constant 5.000000e-01 : f32
    %6 = vector.broadcast %cst_5 : f32 to vector<8x128xf32>
    %7 = arith.mulf %6, %5 : vector<8x128xf32>
    %cst_6 = arith.constant 0.707106769 : f32
    %8 = vector.broadcast %cst_6 : f32 to vector<8x128xf32>
    %9 = arith.mulf %5, %8 : vector<8x128xf32>
    %10 = math.erf %9 : vector<8x128xf32>
    %cst_7 = arith.constant 1.000000e+00 : f32
    %11 = vector.broadcast %cst_7 : f32 to vector<8x128xf32>
    %12 = arith.addf %11, %10 : vector<8x128xf32>
    %13 = arith.mulf %7, %12 : vector<8x128xf32>
    %c0_8 = arith.constant 0 : index
    %c0_9 = arith.constant 0 : index
    %14 = vector.load %arg4[%c0_8, %c0_9] : memref<128x32xf32, #tpu.memory_space<vmem>>, vector<128x32xf32>
    %cst_10 = arith.constant dense<0.000000e+00> : vector<8x32xf32>
    %15 = tpu.matmul %13, %14, %cst_10 {dimension_numbers = #tpu.dot_dimension_numbers<[1], [0], [0], [1], [0, 0, 1, 1], [], []>} : vector<8x128xf32>, vector<128x32xf32>, vector<8x32xf32> -> vector<8x32xf32>
    %c0_11 = arith.constant 0 : index
    %c0_12 = arith.constant 0 : index
    %16 = vector.load %arg7[%c0_11, %c0_12] : memref<8x32xf32, #tpu.memory_space<vmem>>, vector<8x32xf32>
    tpu.vector_store %arg7[%c0_11, %c0_12], %15 {strides = array<i32>} : memref<8x32xf32, #tpu.memory_space<vmem>>, vector<8x32xf32>,
    %c0_13 = arith.constant 0 : index
    %c0_14 = arith.constant 0 : index
    %17 = vector.load %arg7[%c0_13, %c0_14] : memref<8x32xf32, #tpu.memory_space<vmem>>, vector<8x32xf32>
    %c0_15 = arith.constant 0 : index
    %c0_16 = arith.constant 0 : index
    %18 = vector.load %arg5[%c0_15, %c0_16] : memref<1x32xf32, #tpu.memory_space<vmem>>, vector<1x32xf32>
    %19 = vector.broadcast %18 : vector<1x32xf32> to vector<8x32xf32>
    %20 = arith.addf %17, %19 : vector<8x32xf32>
    %c0_17 = arith.constant 0 : index
    %c0_18 = arith.constant 0 : index
    %21 = vector.load %arg6[%c0_17, %c0_18] : memref<8x32xf32, #tpu.memory_space<vmem>>, vector<8x32xf32>
    tpu.vector_store %arg6[%c0_17, %c0_18], %20 {strides = array<i32>} : memref<8x32xf32, #tpu.memory_space<vmem>>, vector<8x32xf32>,
    return
  }
  func.func @transform_0(%arg0: i32) -> (i32, i32) {
    %c0_i32 = arith.constant 0 : i32
    %c0_i32_0 = arith.constant 0 : i32
    return %arg0, %c0_i32 : i32, i32
  }
  func.func @transform_1(%arg0: i32) -> (i32, i32) {
    %c0_i32 = arith.constant 0 : i32
    %c0_i32_0 = arith.constant 0 : i32
    %c0_i32_1 = arith.constant 0 : i32
    return %c0_i32, %c0_i32_0 : i32, i32
  }
  func.func @transform_2(%arg0: i32) -> (i32, i32) {
    %c0_i32 = arith.constant 0 : i32
    %c0_i32_0 = arith.constant 0 : i32
    %c0_i32_1 = arith.constant 0 : i32
    return %c0_i32, %c0_i32_0 : i32, i32
  }
  func.func @transform_3(%arg0: i32) -> (i32, i32) {
    %c0_i32 = arith.constant 0 : i32
    %c0_i32_0 = arith.constant 0 : i32
    %c0_i32_1 = arith.constant 0 : i32
    return %c0_i32, %c0_i32_0 : i32, i32
  }
  func.func @transform_4(%arg0: i32) -> (i32, i32) {
    %c0_i32 = arith.constant 0 : i32
    %c0_i32_0 = arith.constant 0 : i32
    %c0_i32_1 = arith.constant 0 : i32
    return %c0_i32, %c0_i32_0 : i32, i32
  }
  func.func @transform_5(%arg0: i32) -> (i32, i32) {
    %c0_i32 = arith.constant 0 : i32
    %c0_i32_0 = arith.constant 0 : i32
    return %arg0, %c0_i32 : i32, i32
  }
}

</mosaic_0001>

<bundles_post_ra>
// kernel: tpu_custom_call.1
= control target key start
LH: loop header
LB: loop body
LE: loop exit
PB: predicated region body
PF: predicated region fallthrough
CT: control target
= control target key end

     0   :  { %10 = vsyncpa [#allocation4], 0  ;;  %s880_s0 = inlined_call_operand.vmem [shape: f32[16,32], index: 0, kind: input, shape index: {}]   ;;  %s881_s1 = inlined_call_operand.vmem [shape: f32[32,128], index: 1, kind: input, shape index: {}]   ;;  %s882_s2 = inlined_call_operand.vmem [shape: f32[1,128], index: 2, kind: input, shape index: {}]   ;;  %s883_s3 = inlined_call_operand.vmem [shape: f32[128,32], index: 3, kind: input, shape index: {}]   ;;  %s884_s4 = inlined_call_operand.vmem [shape: f32[1,32], index: 4, kind: input, shape index: {}]   ;;  %s885_s5 = inlined_call_operand.hbm [shape: f32[16,32], index: 5, kind: output, shape index: {}]  }
   0x1   :  { %12 = vsyncpa [#allocation4 + $0x1], 0  ;;  %s700_s18 = smov 0   ;;  %s702_s19 = smov 0  }
   0x2   :  { %s704_s20 = smov 0   ;;  %s706_s21 = smov 0  }
   0x3 LB: > { %s721_s22 = sadd.s32 4294967295, %s665_s21   ;;  %s481_s23 = sadd.s32 4294967294, %s665_s21   ;;  %s665_s21 = sphi %s706_s21, %s891_s21   ;;  %s661_s20 = sphi %s704_s20, %s890_s20   ;;  %s657_s19 = sphi %s702_s19, %s889_s19   ;;  %s653_s18 = sphi %s700_s18, %s888_s18  }
   0x4   : > { %s725_s24 = sadd.s32 1, %s665_s21   ;;  %s135_s25 = sadd.s32 1, %s661_s20 }
   0x5   : > { %s132_s26 = ssub.s32 %s665_s21, %s725_s24  ;;  %p145_p0 = scmp.ne.s32.totalorder %s661_s20, %s657_s19 }
   0x6   : > { %p133_p1 = scmp.eq.s32.totalorder %s132_s26, 0  ;;  %p146_p2 = scmp.eq.s32.totalorder %s721_s22, 1 }
   0x7   : > { %p151_p3 = scmp.ne.s32.totalorder %s657_s19, %s653_s18  ;;  %p152_p4 = scmp.eq.s32.totalorder %s481_s23, 1 }
   0x8   : > { %s736_s27 = scalar_select %p133_p1, %s661_s20, %s135_s25  }
   0x9   : > { %p738_p5 = por %p146_p2, %p145_p0  ;;  %p742_p6 = por %p152_p4, %p151_p3 }
   0xa   : > { %p484_p7 = scmp.ge.s32.totalorder %s665_s21, 1  ;;  %p189_p8 = scmp.lt.s32.totalorder %s665_s21, 3 }
   0xc   : > { %p190_p9 = pnand %p484_p7, %p189_p8 }
   0xd   : > { %p216_p10 = scmp.lt.s32.totalorder (!%p190_p9), %s721_s22, 1  ;;  %s213_s26 = sand.u32 (!%p190_p9), 1, %s657_s19  }
   0xe   : > { %193 = sbr.rel (%p190_p9) target bundleno = 459 (0x1cb), region = 40  ;;  %s485_s30 = sshll.u32 (!%p190_p9), %s213_s26, 3 }
   0xf   : > { %s491_s8 = sshll.u32 (!%p190_p9), %s721_s22, 7  ;;  %s215_s9 = scalar_lea.vmem (!%p190_p9), [#allocation3], %s485_s30 }
  0x10   : > { %s422_s10 = sshll.u32 (!%p190_p9), %s215_s9, 4  ;;  %s420_s13 = scalar_lea.hbm (!%p190_p9), %s885_s5, %s491_s8  ;;  %s423_s10 = int_to_ptr.vmem [resolvable:$true] %s422_s10 }
  0x11   : > { %s409_s14 = scalar_lea.sflag (!%p190_p9), [#allocation4], %s213_s26  ;;  %s605_s15 = scalar_lea.vmem (!%p190_p9), %s423_s10, 128 }
  0x12   : > { %p606_p11 = scmp.ne.s32.totalorder (!%p190_p9), %s423_s10, %s605_s15 }
  0x13   : > { %v224_v0 = vld [vmem:[%s881_s1 + $0x18] sm:$0xff]  ;;  %v667_v1 = vmov 0.0   ;;  %v223_v2 = vld [vmem:[%s881_s1 + $0x10] sm:$0xff]  ;;  %vm668_vm0 = vmmov 0   ;;  %s217_s11 = scalar_select %p216_p10, %s721_s22, 1  ;;  %v222_v5 = vld [vmem:[%s881_s1 + $0x8] sm:$0xff] }
  0x14   : > { %516 = vmatprep.subr.mxu0 %v667_v1  ;;  %524 = vmatprep.mubr.msk.f32.mxu0 %vm668_vm0, %v667_v1  ;;  %v326_v3 = vld [vmem:[%s883_s3 + $0x78] sm:$0xff]  ;;  %v325_v4 = vld [vmem:[%s883_s3 + $0x70] sm:$0xff]  ;;  %v324_v6 = vld [vmem:[%s883_s3 + $0x68] sm:$0xff]  ;;  %vm232_vm1 = vcmask 261120   ;;  %p607_p12 = pnand %p606_p11, %p738_p5 }
  0x15   : > { %517 = vmatpush3.msra.mxu0 %v224_v0  ;;  %527 = vmatprep.subr.mxu1 %v667_v1  ;;  %s486_s16 = sshll.u32 %s217_s11, 3  ;;  %v221_v7 = vld [vmem:[%s881_s1] sm:$0xff]  ;;  %v322_v10 = vld [vmem:[%s883_s3 + $0x58] sm:$0xff]  ;;  %v321_v11 = vld [vmem:[%s883_s3 + $0x50] sm:$0xff] }
  0x16   : > { %518 = vmatprep.subr.mxu0 %v667_v1  ;;  %528 = vmatpush3.msra.mxu1 %v326_v3  ;;  %s219_s7 = scalar_lea.vmem %s880_s0, %s486_s16  ;;  %v323_v9 = vld [vmem:[%s883_s3 + $0x60] sm:$0xff]  ;;  %v320_v12 = vld [vmem:[%s883_s3 + $0x48] sm:$0xff]  ;;  %v318_v14 = vld [vmem:[%s883_s3 + $0x38] sm:$0xff]  ;;  %p608_p13 = pneg %p607_p12 }
  0x17   : > { %519 = vmatpush3.msra.mxu0 %v223_v2  ;;  %529 = vmatprep.subr.mxu1 %v667_v1  ;;  %v220_v8 = vld [vmem:[%s219_s7] sm:$0xff]  ;;  %v317_v15 = vld [vmem:[%s883_s3 + $0x30] sm:$0xff]  ;;  %v316_v16 = vld [vmem:[%s883_s3 + $0x28] sm:$0xff]  ;;  %s669_s16 = smov [#allocation3]  }
  0x18   : > { %520 = vmatprep.subr.mxu0 %v667_v1  ;;  %530 = vmatpush3.msra.mxu1 %v325_v4  ;;  %v319_v13 = vld [vmem:[%s883_s3 + $0x40] sm:$0xff]  ;;  %v314_v18 = vld [vmem:[%s883_s3 + $0x18] sm:$0xff]  ;;  %v313_v19 = vld [vmem:[%s883_s3 + $0x10] sm:$0xff]  ;;  %s609_s17 = sshll.u32 %s669_s16, 4  ;;  %s610_s17 = int_to_ptr.vmem [resolvable:$false] %s609_s17 }
  0x19   : > { %521 = vmatpush3.msra.mxu0 %v222_v5  ;;  %531 = vmatprep.subr.mxu1 %v667_v1  ;;  %v315_v17 = vld [vmem:[%s883_s3 + $0x20] sm:$0xff]  ;;  %v312_v20 = vld [vmem:[%s883_s3 + $0x8] sm:$0xff]  ;;  %s611_s22 = scalar_lea.vmem %s610_s17, 256  ;;  %p612_p0 = scmp.lt.s32.totalorder %s423_s10, %s610_s17 }
  0x1a   : > { %522 = vmatprep.subr.mxu0 %v667_v1  ;;  %532 = vmatpush3.msra.mxu1 %v324_v6  ;;  %v311_v21 = vld [vmem:[%s883_s3] sm:$0xff]  ;;  %p613_p1 = scmp.lt.s32.totalorder %s611_s22, %s605_s15 }
  0x1b   : > { %523 = vmatpush3.msra.mxu0 %v221_v7  ;;  %533 = vmatprep.subr.mxu1 %v667_v1  ;;  %v487_v22 = vld [vmem:[%s882_s2] ss:$0 sm:$0xff] }
  0x1c   : > { %525 = vmatmul.mubr.msk.f32.vlgmr.msra.gmra.mxu0 %vm232_vm1, %v220_v8  ;;  %534 = vmatpush3.msra.mxu1 %v323_v9  ;;  %v489_v33 = vld [vmem:[%s884_s4] ss:$0 sm:$0xff]  ;;  %p614_p2 = por %p613_p1, %p612_p0 }
  0x1d   : > { %535 = vmatprep.subr.mxu1 %v667_v1  ;;  %559 = vmatprep.mubr.msk.f32.mxu1 %vm668_vm0, %v667_v1 }
  0x1e   : > { %536 = vmatpush3.msra.mxu1 %v322_v10  ;;  %p615_p3 = pnand %p614_p2, %p608_p13 }
  0x1f   : > { %537 = vmatprep.subr.mxu1 %v667_v1 }
  0x20   : > { %538 = vmatpush3.msra.mxu1 %v321_v11 }
  0x21   : > { %539 = vmatprep.subr.mxu1 %v667_v1 }
  0x22   : > { %540 = vmatpush3.msra.mxu1 %v320_v12 }
  0x23   : > { %541 = vmatprep.subr.mxu1 %v667_v1 }
  0x24   : > { %542 = vmatpush3.msra.mxu1 %v319_v13 }
  0x25   : > { %543 = vmatprep.subr.mxu1 %v667_v1 }
  0x26   : > { %544 = vmatpush3.msra.mxu1 %v318_v14 }
  0x27   : > { %545 = vmatprep.subr.mxu1 %v667_v1 }
  0x28   : > { %546 = vmatpush3.msra.mxu1 %v317_v15 }
  0x29   : > { %547 = vmatprep.subr.mxu1 %v667_v1 }
  0x2a   : > { %548 = vmatpush3.msra.mxu1 %v316_v16 }
  0x2b   : > { %549 = vmatprep.subr.mxu1 %v667_v1 }
  0x2c   : > { %550 = vmatpush3.msra.mxu1 %v315_v17 }
  0x2d   : > { %551 = vmatprep.subr.mxu1 %v667_v1 }
  0x2e   : > { %552 = vmatpush3.msra.mxu1 %v314_v18 }
  0x2f   : > { %553 = vmatprep.subr.mxu1 %v667_v1 }
  0x30   : > { %554 = vmatpush3.msra.mxu1 %v313_v19 }
  0x31   : > { %555 = vmatprep.subr.mxu1 %v667_v1 }
  0x32   : > { %556 = vmatpush3.msra.mxu1 %v312_v20 }
  0x33   : > { %557 = vmatprep.subr.mxu1 %v667_v1 }
  0x34   : > { %558 = vmatpush3.msra.mxu1 %v311_v21 }
  0xdc   : > { %v302_v23 = vpop.f32.mrf.mxu0 }
  0xdd   : > { %v303_v24 = vadd.f32 %v487_v22, %v302_v23 }
  0xde   : > { %v526_v25 = vpop.f32.mrf.mxu0 }
  0xdf   : > { %v307_v26 = vmul.f32 0.70710677, %v303_v24  ;;  %v306_v28 = vmul.f32 0.5, %v303_v24 }
  0xe1   : > { %603 = verf.f32 %v307_v26 }
  0xee   : > { %v604_v27 = vpop.eup %603 }
  0xef   : > { %v309_v29 = vadd.f32 1.0, %v604_v27 }
  0xf1   : > { %v310_v30 = vmul.f32 %v309_v29, %v306_v28 }
  0xf3   : > { %560 = vmatmul.mubr.f32.vlgmr.msra.gmra.mxu1 %v310_v30 }
 0x1b3   : > { %v393_v31 = vpop.f32.mrf.mxu1 }
 0x1b4   : > { %397 = vst.msk [vmem:[#allocation2] sm:$0xff] %vm232_vm1, %v393_v31 }
 0x1b5   : > { %v561_v32 = vpop.f32.mrf.mxu1 }
 0x1bb   : > { %v398_v34 = vld [vmem:[#allocation2] sm:$0xff] }
 0x1bc   : > { %v406_v35 = vadd.f32 %v489_v33, %v398_v34 }
 0x1be   : > { %407 = vst.msk [vmem:[%s215_s9] sm:$0xff] %vm232_vm1, %v406_v35 }
 0x1bf   : > { %618 = shalt.err (!%p615_p3)
}
 0x1c0   : > { %s619_s23 = scalar_lea.hbm %s420_s13, 128  ;;  %s623_s30 = scalar_lea.hbm %s885_s5, 256 }
 0x1c1   : > { %p620_p4 = scmp.ne.s32.totalorder %s420_s13, %s619_s23  ;;  %p624_p9 = scmp.lt.s32.totalorder %s420_s13, %s885_s5 }
 0x1c2   : > { %p625_p10 = scmp.lt.s32.totalorder %s623_s30, %s619_s23 }
 0x1c3   : > { %p621_p7 = pnand %p620_p4, %p738_p5 }
 0x1c4   : > { %p626_p11 = por %p625_p10, %p624_p9 }
 0x1c5   : > { %p622_p8 = pneg %p621_p7 }
 0x1c7   : > { %p627_p12 = pnand %p626_p11, %p622_p8 }
 0x1c9   : > { %630 = shalt.err (!%p627_p12)
}
 0x1ca   : > { %562 = dma.vmem_to_hbm [thread:$0]  (%p738_p5), %s423_s10, 128, %s420_s13, %s409_s14  }
 0x1cb PF: > { %p568_p13 = scmp.ge.s32.totalorder %s665_s21, 2  ;;  %s434_s8 = sand.u32 1, %s653_s18  }
 0x1cc   : > { %s435_s9 = scalar_lea.sflag [#allocation4], %s434_s8 }
 0x1cd   : > { %p565_p0 = pnand %p568_p13, %p742_p6 }
 0x1cf   : > { %p566_p1 = pneg %p565_p0 }
 0x1d1   : > { %648 = dma.done.wait (%p566_p1), %s435_s9, 128  }
 0x1d2   : > { %650 = vsyncadd (%p566_p1), %s435_s9, 4294967168  ;;  %p15_p2 = scmp.ge.s32.totalorder %s725_s24, 4   ;;  %s888_s18 = smov %s657_s19 }
 0x1d3   : > { %s889_s19 = smov %s661_s20  ;;  %s890_s20 = smov %s736_s27 }
 0x1d4   : > { %s891_s21 = smov %s725_s24  ;;  %17 = sbr.rel (!%p15_p2) target bundleno = 3 (0x3), region = 75 }
 0x1d9   :  { %440 = vsyncpa [#allocation4], 1 }
 0x1da   :  { %442 = vsyncpa [#allocation4 + $0x1], 1 }

</bundles_post_ra>
